<compile_context>
chip_gen: v7x
topology: tpu7x:2x2x1
jax: 0.10.0
libtpu: 0.0.40
codegen_flags: <defaults>
</compile_context>

<pallas_src>
import jax
import jax.numpy as jnp
from jax import lax
from jax.experimental import pallas as pl
from jax.experimental.pallas import tpu as pltpu


def _attention_kernel(x_ref, q_ref, vl_ref, ctx_ref, attn_ref):
    x = x_ref[...].astype(jnp.float32)       # (bt, S, H)
    q = q_ref[...].astype(jnp.float32)       # (1, H), lane-major
    vl = vl_ref[...]                         # (bt, 1) int32

    bt, s, _ = x.shape

    # Dot-product scores: VPU multiply + lane reduce over H.
    scores = jnp.sum(x * q, axis=-1)         # (bt, S)

    # Mask positions >= valid_len with -1e9 (matches torch.where in reference).
    pos = lax.broadcasted_iota(jnp.int32, (bt, s), 1)
    scores = jnp.where(pos < vl, scores, jnp.float32(-1e9))

    # Softmax over the sequence axis; exact normalizer so the returned
    # attention weights sum to 1 (review correctness concern).
    m = jnp.max(scores, axis=-1, keepdims=True)
    e = jnp.exp(scores - m)
    denom = jnp.sum(e, axis=-1, keepdims=True)
    attn = e / denom                          # (bt, S)

    # Weighted average over the sequence axis.
    ctx = jnp.sum(attn[:, :, None] * x, axis=1)   # (bt, H)

    ctx_ref[...] = ctx.astype(ctx_ref.dtype)
    attn_ref[...] = attn.astype(attn_ref.dtype)


def _vmem_budget():
    """Returns (vmem_limit_bytes for the compiler, byte budget for tiling)."""
    phys = None
    try:
        phys = getattr(pltpu.get_tpu_info(), "vmem_capacity_bytes", None)
    except Exception:
        phys = None
    if not phys:
        phys = 64 << 20                      # conservative: v7x per-core VMEM
    # ~96 MiB on 128 MiB parts (v5e/v6e), ~48 MiB on 64 MiB parts (v7x).
    limit = max(32 << 20, min(int(phys) * 3 // 4, 100 << 20))
    # Tile-sizing budget capped so the chosen tile is safe on every generation.
    budget = min(limit, 48 << 20)
    return limit, budget


def _pick_b_tile(batch, seq, hidden, x_itemsize, budget_bytes):
    """Largest batch tile whose VMEM footprint fits the budget."""
    row_bytes = seq * hidden * x_itemsize
    # Per grid step: 2x double-buffered X block + one f32 (bt,S,H) temporary
    # (attn[:, :, None] * x) + small outputs / q / vl (2 MiB slack below).
    per_row = 2 * row_bytes + seq * hidden * 4
    usable = max(budget_bytes - (2 << 20), per_row)
    max_rows = max(1, usable // per_row)
    if max_rows >= batch:
        return int(batch)                    # whole batch in a single block
    # Keep >= 2 grid steps (megacore sharding on v7x) and a sublane-aligned tile.
    bt = min(max_rows, max(pl.cdiv(batch, 2), 8))
    bt = max(8, (bt // 8) * 8)
    return int(bt)


def attention_forward(x, valid_lens, q, *, b_tile=None):
    """x: [B, S, H] float32, valid_lens: [B] int, q: [H, 1] float32.

    Returns (context [B, H], attention_weights [B, S])."""
    B, S, H = x.shape

    vmem_limit, budget = _vmem_budget()
    if b_tile is None:
        b_tile = _pick_b_tile(B, S, H, x.dtype.itemsize, budget)
    b_tile = int(min(b_tile, B))
    if b_tile < B:
        # Sub-batch tiles must be sublane-aligned for the 2-D blocks.
        b_tile = min(max(8, (b_tile // 8) * 8), B)

    n_tiles = int(pl.cdiv(B, b_tile))
    B_pad = n_tiles * b_tile

    # Only the (tiny) valid_lens vector is ever padded; X is never copied.
    # Pad value 0 => edge rows are fully masked, so whatever the masked-DMA
    # edge block leaves in VMEM can never become a non-finite value we keep.
    vl2d = valid_lens.astype(jnp.int32).reshape(B, 1)
    if B_pad != B:
        vl2d = jnp.pad(vl2d, ((0, B_pad - B), (0, 0)))

    q_row = q.reshape(1, H).astype(jnp.float32)      # lane-major q

    grid_spec = pltpu.PrefetchScalarGridSpec(
        num_scalar_prefetch=0,
        grid=(n_tiles,),
        in_specs=[
            pl.BlockSpec((b_tile, S, H), lambda i: (i, 0, 0)),
            pl.BlockSpec((1, H), lambda i: (0, 0)),
            pl.BlockSpec((b_tile, 1), lambda i: (i, 0)),
        ],
        out_specs=[
            pl.BlockSpec((b_tile, H), lambda i: (i, 0)),
            pl.BlockSpec((b_tile, S), lambda i: (i, 0)),
        ],
    )

    ctx, attn = pl.pallas_call(
        _attention_kernel,
        out_shape=(
            jax.ShapeDtypeStruct((B, H), jnp.float32),
            jax.ShapeDtypeStruct((B, S), jnp.float32),
        ),
        grid_spec=grid_spec,
        compiler_params=pltpu.CompilerParams(
            dimension_semantics=("parallel",),    # megacore sharding on v7x
            vmem_limit_bytes=vmem_limit,
        ),
    )(x, q_row, vl2d)

    return ctx, attn


def attention_reference(x, valid_lens, q):
    """Plain-JAX reference mirroring the PyTorch forward."""
    B, S, H = x.shape
    scores = jnp.matmul(x, q).squeeze(-1)                       # (B, S)
    arange = jnp.arange(S, dtype=jnp.float32)[None, :]
    mask = arange < valid_lens[:, None].astype(jnp.float32)
    scores = jnp.where(mask, scores, jnp.float32(-1e9))
    attn = jax.nn.softmax(scores, axis=-1)
    ctx = jnp.matmul(attn[:, None, :], x).squeeze(1)            # (B, H)
    return ctx, attn


if __name__ == "__main__":
    key = jax.random.PRNGKey(0)

    # --- small shape consistent with the module (B=2, S=8, H=32) ---
    B, S, H = 2, 8, 32
    kx, kq, kx2, kl2 = jax.random.split(key, 4)

    x = jax.random.normal(kx, (B, S, H), dtype=jnp.float32)
    # q ~ U(-0.5, 0.5), matching torch.rand(H,1)*(0.5-(-0.5))+(-0.5)
    q = jax.random.uniform(kq, (H, 1), dtype=jnp.float32,
                           minval=-0.5, maxval=0.5)
    valid_lens = jnp.array([5, 8], dtype=jnp.int32)

    ctx, attn = attention_forward(x, valid_lens, q)
    ctx = jax.block_until_ready(ctx)
    attn = jax.block_until_ready(attn)

    ctx_ref, attn_ref = attention_reference(x, valid_lens, q)
    assert jnp.allclose(ctx, ctx_ref, atol=1e-5, rtol=1e-5)
    assert jnp.allclose(attn, attn_ref, atol=1e-5, rtol=1e-5)

    # --- ragged multi-tile path: B not a multiple of b_tile, no X padding ---
    B2 = 20
    x2 = jax.random.normal(kx2, (B2, S, H), dtype=jnp.float32)
    vl2 = jax.random.randint(kl2, (B2,), 1, S + 1, dtype=jnp.int32)

    ctx2, attn2 = attention_forward(x2, vl2, q, b_tile=8)   # 3 tiles, last partial
    ctx2 = jax.block_until_ready(ctx2)
    attn2 = jax.block_until_ready(attn2)

    ctx2_ref, attn2_ref = attention_reference(x2, vl2, q)
    assert jnp.allclose(ctx2, ctx2_ref, atol=1e-5, rtol=1e-5)
    assert jnp.allclose(attn2, attn2_ref, atol=1e-5, rtol=1e-5)

    print("KERNEL_OK")
</pallas_src>

<mosaic_0001>
module attributes {stable_mosaic.version = 11 : i64} {
  func.func @_attention_kernel(%arg0: i32, %arg1: memref<2x8x32xf32, #tpu.memory_space<vmem>>, %arg2: memref<1x32xf32, #tpu.memory_space<vmem>>, %arg3: memref<2x1xi32, #tpu.memory_space<vmem>>, %arg4: memref<2x32xf32, #tpu.memory_space<vmem>>, %arg5: memref<2x8xf32, #tpu.memory_space<vmem>>) attributes {dimension_semantics = [#tpu.dimension_semantics<parallel>], iteration_bounds = array<i64: 1>, scalar_prefetch = 0 : i64, scratch_operands = 0 : i64, tpu.core_type = #tpu.core_type<tc>, window_params = [{transform_indices = @transform_0, window_bounds = array<i64: 2, 8, 32>}, {pipeline_mode = #tpu.pipeline_mode<synchronous>, transform_indices = @transform_1, window_bounds = array<i64: 1, 32>}, {transform_indices = @transform_2, window_bounds = array<i64: 2, 1>}, {transform_indices = @transform_3, window_bounds = array<i64: 2, 32>}, {transform_indices = @transform_4, window_bounds = array<i64: 2, 8>}]} {
    %c0 = arith.constant 0 : index
    %c0_0 = arith.constant 0 : index
    %c0_1 = arith.constant 0 : index
    %0 = vector.load %arg1[%c0, %c0_0, %c0_1] : memref<2x8x32xf32, #tpu.memory_space<vmem>>, vector<2x8x32xf32>
    %c0_2 = arith.constant 0 : index
    %c0_3 = arith.constant 0 : index
    %1 = vector.load %arg2[%c0_2, %c0_3] : memref<1x32xf32, #tpu.memory_space<vmem>>, vector<1x32xf32>
    %c0_4 = arith.constant 0 : index
    %c0_5 = arith.constant 0 : index
    %2 = vector.load %arg3[%c0_4, %c0_5] : memref<2x1xi32, #tpu.memory_space<vmem>>, vector<2x1xi32>
    %3 = vector.shape_cast %1 : vector<1x32xf32> to vector<1x1x32xf32>
    %4 = vector.broadcast %3 : vector<1x1x32xf32> to vector<2x8x32xf32>
    %5 = arith.mulf %0, %4 : vector<2x8x32xf32>
    %cst = arith.constant dense<0.000000e+00> : vector<2x8xf32>
    %6 = vector.multi_reduction <add>, %5, %cst [2] : vector<2x8x32xf32> to vector<2x8xf32>
    %7 = tpu.iota {dimensions = array<i32: 1>} : vector<2x8xi32>
    %8 = vector.broadcast %2 : vector<2x1xi32> to vector<2x8xi32>
    %9 = arith.cmpi slt, %7, %8 : vector<2x8xi32>
    %cst_6 = arith.constant -1.000000e+09 : f32
    %10 = vector.broadcast %cst_6 : f32 to vector<2x8xf32>
    %11 = arith.select %9, %6, %10 : vector<2x8xi1>, vector<2x8xf32>
    %cst_7 = arith.constant dense<0xFF800000> : vector<2xf32>
    %12 = vector.multi_reduction <maximumf>, %11, %cst_7 [1] : vector<2x8xf32> to vector<2xf32>
    %13 = vector.shape_cast %12 : vector<2xf32> to vector<2x1xf32>
    %14 = vector.broadcast %13 : vector<2x1xf32> to vector<2x8xf32>
    %15 = arith.subf %11, %14 : vector<2x8xf32>
    %16 = math.exp %15 : vector<2x8xf32>
    %cst_8 = arith.constant dense<0.000000e+00> : vector<2xf32>
    %17 = vector.multi_reduction <add>, %16, %cst_8 [1] : vector<2x8xf32> to vector<2xf32>
    %18 = vector.shape_cast %17 : vector<2xf32> to vector<2x1xf32>
    %19 = vector.broadcast %18 : vector<2x1xf32> to vector<2x8xf32>
    %20 = arith.divf %16, %19 : vector<2x8xf32>
    %21 = vector.shape_cast %20 : vector<2x8xf32> to vector<2x8x1xf32>
    %22 = vector.broadcast %21 : vector<2x8x1xf32> to vector<2x8x32xf32>
    %23 = arith.mulf %22, %0 : vector<2x8x32xf32>
    %cst_9 = arith.constant dense<0.000000e+00> : vector<2x32xf32>
    %24 = vector.multi_reduction <add>, %23, %cst_9 [1] : vector<2x8x32xf32> to vector<2x32xf32>
    %c0_10 = arith.constant 0 : index
    %c0_11 = arith.constant 0 : index
    %25 = vector.load %arg4[%c0_10, %c0_11] : memref<2x32xf32, #tpu.memory_space<vmem>>, vector<2x32xf32>
    tpu.vector_store %arg4[%c0_10, %c0_11], %24 {strides = array<i32>} : memref<2x32xf32, #tpu.memory_space<vmem>>, vector<2x32xf32>,
    %c0_12 = arith.constant 0 : index
    %c0_13 = arith.constant 0 : index
    %26 = vector.load %arg5[%c0_12, %c0_13] : memref<2x8xf32, #tpu.memory_space<vmem>>, vector<2x8xf32>
    tpu.vector_store %arg5[%c0_12, %c0_13], %20 {strides = array<i32>} : memref<2x8xf32, #tpu.memory_space<vmem>>, vector<2x8xf32>,
    return
  }
  func.func @transform_0(%arg0: i32) -> (i32, i32, i32) {
    %c0_i32 = arith.constant 0 : i32
    %c0_i32_0 = arith.constant 0 : i32
    %c0_i32_1 = arith.constant 0 : i32
    return %arg0, %c0_i32, %c0_i32_0 : i32, i32, i32
  }
  func.func @transform_1(%arg0: i32) -> (i32, i32) {
    %c0_i32 = arith.constant 0 : i32
    %c0_i32_0 = arith.constant 0 : i32
    %c0_i32_1 = arith.constant 0 : i32
    return %c0_i32, %c0_i32_0 : i32, i32
  }
  func.func @transform_2(%arg0: i32) -> (i32, i32) {
    %c0_i32 = arith.constant 0 : i32
    %c0_i32_0 = arith.constant 0 : i32
    return %arg0, %c0_i32 : i32, i32
  }
  func.func @transform_3(%arg0: i32) -> (i32, i32) {
    %c0_i32 = arith.constant 0 : i32
    %c0_i32_0 = arith.constant 0 : i32
    return %arg0, %c0_i32 : i32, i32
  }
  func.func @transform_4(%arg0: i32) -> (i32, i32) {
    %c0_i32 = arith.constant 0 : i32
    %c0_i32_0 = arith.constant 0 : i32
    return %arg0, %c0_i32 : i32, i32
  }
}

</mosaic_0001>

<bundles_post_ra>
// kernel: tpu_custom_call.1
= control target key start
LH: loop header
LB: loop body
LE: loop exit
PB: predicated region body
PF: predicated region fallthrough
CT: control target
= control target key end

     0   :  { %10 = vsyncpa [#allocation3], 0  ;;  %s324_s0 = inlined_call_operand.hbm [shape: f32[2,8,32], index: 0, kind: input, shape index: {}]   ;;  %s325_s1 = inlined_call_operand.vmem [shape: f32[1,32], index: 1, kind: input, shape index: {}]   ;;  %s326_s2 = inlined_call_operand.vmem [shape: s32[2,1], index: 2, kind: input, shape index: {}]   ;;  %s327_s3 = inlined_call_operand.hbm [shape: f32[2,32], index: 3, kind: output, shape index: {0}]   ;;  %s328_s4 = inlined_call_operand.hbm [shape: f32[2,8], index: 4, kind: output, shape index: {1}]  }
   0x1   :  { %11 = vsyncpa [#allocation4], 0 }
   0x2   :  { %12 = vsyncpa [#allocation7], 0  ;;  %s234_s15 = smov [#allocation2]   ;;  %s162_s19 = scalar_lea.hbm %s324_s0, 256 }
   0x3   :  { %s18_s16 = sshll.u32 %s234_s15, 4  ;;  %p163_p0 = scmp.ne.s32.totalorder %s324_s0, %s162_s19  ;;  %s19_s16 = int_to_ptr.vmem [resolvable:$true] %s18_s16 }
   0x4   :  { %p166_p1 = scmp.lt.u32.totalorder %s162_s19, %s324_s0 }
   0x6   :  { %p168_p2 = pnand %p166_p1, %p163_p0 }
   0x8   :  { %171 = shalt.err (!%p168_p2)
}
   0x9   :  { %s172_s24 = scalar_lea.vmem %s19_s16, 256  ;;  %p177_p4 = scmp.lt.s32.totalorder %s19_s16, %s19_s16 }
   0xa   :  { %p173_p3 = scmp.ne.s32.totalorder %s19_s16, %s172_s24  ;;  %p178_p5 = scmp.lt.s32.totalorder %s172_s24, %s172_s24 }
   0xc   :  { %p179_p6 = por %p178_p5, %p177_p4 }
   0xe   :  { %p180_p7 = pnand %p179_p6, %p173_p3 }
  0x10   :  { %183 = shalt.err (!%p180_p7)
}
  0x11   :  { %s235_s25 = smov 128   ;;  %s236_s26 = smov 8  }
  0x12   :  { %24 = dma.hbm_to_vmem [thread:$0]  %s324_s0, 256, %s19_s16, [#allocation3], %s235_s25, %s235_s25, %s236_s26  }
  0x13   :  { %228 = dma.done.wait [#allocation3], 256  }
  0x14   :  { %229 = vsyncadd [#allocation3], 4294967040  ;;  %v237_v0 = vmov 0   ;;  %v277_v1 = vld [vmem:[#allocation2] sm:$0xff]  ;;  %vm44_vm0 = vcmask 261120   ;;  %v282_v3 = vld [vmem:[#allocation2 + $0x8] sm:$0xff]  ;;  %v51_v9 = vlaneseq }
  0x15   :  { %156 = vset.pattern.permute.xlu1 %v237_v0  ;;  %157 = vset.pattern.permute.xlu0 %v237_v0  ;;  %v149_v2 = vld [vmem:[%s325_s1] ss:$0 sm:$0xff]  ;;  %vm67_vm1 = vcmask 1041409   ;;  %vm71_vm3 = vcmask 58368   ;;  %s238_s1 = smov [#allocation6]  }
  0x16   :  { %v42_v4 = vmul.f32 %v149_v2, %v277_v1  ;;  %v43_v5 = vmul.f32 %v149_v2, %v282_v3  ;;  %v35_v6 = vld [vmem:[%s326_s2] sm:$0x3]  ;;  %v52_v10 = vand.u32 127, %v51_v9  ;;  %v60_v11 = vshrl.u32 %v51_v9, 7  ;;  %s136_s2 = sshll.u32 %s238_s1, 4  ;;  %s137_s2 = int_to_ptr.vmem [resolvable:$true] %s136_s2 }
  0x17   :  { %54 = vperm.xlu1 %156, %v35_v6   ;;  %s184_s6 = scalar_lea.vmem %s137_s2, 32  ;;  %p189_p9 = scmp.lt.s32.totalorder %s137_s2, %s137_s2 }
  0x18   :  { %v45_v7 = vsel %vm44_vm0, %v42_v4, 0.0  ;;  %v48_v8 = vsel %vm44_vm0, %v43_v5, 0.0  ;;  %v61_v13 = vsub.s32 %v52_v10, %v60_v11  ;;  %v85_v27 = vsub.s32 0, %v60_v11  ;;  %p185_p8 = scmp.ne.s32.totalorder %s137_s2, %s184_s6  ;;  %p190_p10 = scmp.lt.s32.totalorder %s184_s6, %s184_s6 }
  0x19   :  { %46 = vadd.xlane.f32.xlu0 %v45_v7  ;;  %v92_v31 = vsub.s32 1, %v60_v11 }
  0x1a   :  { %p191_p11 = por %p190_p10, %p189_p9 }
  0x1c   :  { %p192_p12 = pnand %p191_p11, %p185_p8 }
  0x1d   :  { %49 = vadd.xlane.f32.xlu0 %v48_v8 }
  0x96   :  { %v55_v14 = vpop.permute.xlu1 %54 }
  0x97   :  { %vm56_vm2 = vcmp.lt.s32.totalorder %v52_v10, %v55_v14 }
  0xa6   :  { %v47_v12 = vpop.xlane.xlu0 %46 }
  0xa7   :  { %v62_v16 = vrot.slane %v47_v12, %v61_v13 }
  0xaa   :  { %v50_v15 = vpop.xlane.xlu0 %49 }
  0xab   :  { %v66_v17 = vrot.slane %v50_v15, %v61_v13 }
  0xad   :  { %v68_v18 = vsel %vm67_vm1, %v66_v17, %v62_v16 }
  0xae   :  { %v70_v19 = vsel %vm56_vm2, %v68_v18, -1e+09 }
  0xaf   :  { %v72_v20 = vsel %vm71_vm3, %v70_v19, -inf }
  0xb0   :  { %73 = vmax.xlane.f32.xlu1 %v72_v20 }
 0x13d   :  { %v74_v21 = vpop.xlane.xlu1 %73 }
 0x13e   :  { %v75_v22 = vsub.f32 %v70_v19, %v74_v21 }
 0x140   :  { %v76_v23 = vmul.f32 1.442695, %v75_v22 }
 0x142   :  { %158 = vpow2.f32 %v76_v23 }
 0x14c   :  { %v159_v24 = vpop.eup %158 }
 0x14d   :  { %v78_v25 = vsel %vm71_vm3, %v159_v24, 0.0 }
 0x14e   :  { %79 = vadd.xlane.f32.xlu0 %v78_v25 }
 0x1db   :  { %v80_v26 = vpop.xlane.xlu0 %79 }
 0x1dc   :  { %160 = vrcp.f32 %v80_v26 }
 0x1e6   :  { %v161_v28 = vpop.eup %160 }
 0x1e7   :  { %v82_v29 = vmul.f32 %v161_v28, %v159_v24 }
 0x1e9   :  { %v86_v30 = vrot.slane %v82_v29, %v85_v27  ;;  %119 = vst.msk [vmem:[#allocation6] sm:$0x3] %vm71_vm3, %v82_v29  ;;  %v93_v32 = vrot.slane %v82_v29, %v92_v31 }
 0x1eb   :  { %88 = vbcast.lane.b32.xlu0 %v86_v30, 256 }
 0x1ef   :  { %95 = vbcast.lane.b32.xlu0 %v93_v32, 256 }
 0x1f0   :  { %195 = shalt.err (!%p192_p12)
}
 0x1f1   :  { %s196_s9 = scalar_lea.hbm %s328_s4, 32 }
 0x1f2   :  { %p197_p13 = scmp.ne.s32.totalorder %s328_s4, %s196_s9  ;;  %p200_p0 = scmp.lt.u32.totalorder %s196_s9, %s328_s4 }
 0x1f4   :  { %p202_p1 = pnand %p200_p0, %p197_p13 }
 0x1f6   :  { %205 = shalt.err (!%p202_p1)
}
 0x1f7   :  { %139 = dma.vmem_to_hbm [thread:$0]  %s137_s2, 32, %s328_s4, [#allocation7]   ;;  %vm117_vm4 = vcmask 254976  }
 0x1f8   :  { %s239_s4 = smov [#allocation5]  }
 0x1f9   :  { %s126_s16 = sshll.u32 %s239_s4, 4  ;;  %s127_s16 = int_to_ptr.vmem [resolvable:$true] %s126_s16 }
 0x1fa   :  { %s206_s17 = scalar_lea.vmem %s127_s16, 32  ;;  %p211_p3 = scmp.lt.s32.totalorder %s127_s16, %s127_s16 }
 0x1fb   :  { %p207_p2 = scmp.ne.s32.totalorder %s127_s16, %s206_s17  ;;  %p212_p4 = scmp.lt.s32.totalorder %s206_s17, %s206_s17 }
 0x1fd   :  { %p213_p5 = por %p212_p4, %p211_p3 }
 0x1ff   :  { %p214_p6 = pnand %p213_p5, %p207_p2 }
 0x25d   :  { %v89_v33 = vpop.permute.xlu0 %88 }
 0x25e   :  { %v97_v34 = vmul.f32 %v89_v33, %v277_v1 }
 0x260   :  { %v99_v35 = vsel %vm44_vm0, %v97_v34, 0.0 }
 0x261   :  { %v100_v36 = vrot.slane %v99_v35, 4  ;;  %v96_v37 = vpop.permute.xlu0 %95 }
 0x262   :  { %v98_v38 = vmul.f32 %v96_v37, %v282_v3 }
 0x263   :  { %v101_v39 = vadd.f32 %v100_v36, %v99_v35 }
 0x264   :  { %v106_v40 = vsel %vm44_vm0, %v98_v38, 0.0 }
 0x265   :  { %v102_v41 = vrot.slane %v101_v39, 2  ;;  %v107_v42 = vrot.slane %v106_v40, 4 }
 0x267   :  { %v103_v43 = vadd.f32 %v102_v41, %v101_v39  ;;  %v108_v44 = vadd.f32 %v107_v42, %v106_v40 }
 0x269   :  { %v109_v45 = vrot.slane %v108_v44, 2  ;;  %v104_v46 = vrot.slane %v103_v43, 1 }
 0x26b   :  { %v110_v47 = vadd.f32 %v109_v45, %v108_v44  ;;  %v105_v49 = vadd.f32 %v104_v46, %v103_v43 }
 0x26d   :  { %v111_v48 = vrot.slane %v110_v47, 1 }
 0x26f   :  { %v112_v50 = vadd.f32 %v111_v48, %v110_v47 }
 0x271   :  { %v115_v51 = vsel %vm67_vm1, %v112_v50, %v105_v49 }
 0x272   :  { %118 = vst.msk [vmem:[#allocation5] sm:$0x3] %vm117_vm4, %v115_v51 }
 0x273   :  { %217 = shalt.err (!%p214_p6)
}
 0x274   :  { %s218_s20 = scalar_lea.hbm %s327_s3, 32 }
 0x275   :  { %p219_p7 = scmp.ne.s32.totalorder %s327_s3, %s218_s20  ;;  %p222_p8 = scmp.lt.u32.totalorder %s218_s20, %s327_s3 }
 0x277   :  { %p224_p9 = pnand %p222_p8, %p219_p7 }
 0x279   :  { %227 = shalt.err (!%p224_p9)
}
 0x27a   :  { %129 = dma.vmem_to_hbm [thread:$0]  %s127_s16, 32, %s327_s3, [#allocation4]  }
 0x27b   :  { %230 = dma.done.wait [#allocation4], 32  }
 0x27c   :  { %231 = vsyncadd [#allocation4], 4294967264 }
 0x27d   :  { %232 = dma.done.wait [#allocation7], 32  }
 0x27e   :  { %233 = vsyncadd [#allocation7], 4294967264 }
 0x27f   :  { %146 = vsyncpa [#allocation3], 1 }
 0x280   :  { %147 = vsyncpa [#allocation4], 1 }
 0x281   :  { %148 = vsyncpa [#allocation7], 1 }

</bundles_post_ra>
